<compile_context>
chip_gen: v5e
topology: v5e:2x2
jax: 0.10.0
libtpu: 0.0.40
codegen_flags: <defaults>
</compile_context>

<pallas_src>
import functools

import jax
import jax.numpy as jnp
from jax.experimental import pallas as pl
from jax.experimental.pallas import tpu as pltpu

_LANE = 128
_NEG = -1.0e30  # bias for padded logit columns -> exp() underflows to exactly 0


def _round_up(n, m):
    return ((n + m - 1) // m) * m


def _policy_kernel(x_ref, w_ref, b_ref, o_ref, *, in_dim, out_dim):
    # x_ref: [TILE_B, in_dim]  f32  (streamed per grid step, unpadded)
    # w_ref: [3, S, S]         bf16 (resident: W1 | W2 | W3, stored as [in, out])
    # b_ref: [3, 1, S]         f32  (resident: b1 | b2 | b3; b3 padded with -1e30)
    # o_ref: [TILE_B, out_dim] f32  (streamed; only the real action columns)
    x = x_ref[...].astype(w_ref.dtype)

    # fc1 + ReLU: only the real input columns of W1 (static, zero-cost ref slice).
    h = jnp.dot(x, w_ref[0, 0:in_dim, :], preferred_element_type=jnp.float32) + b_ref[0]
    h = jnp.maximum(h, 0.0)

    # fc2 + ReLU (padded hidden columns are exactly 0: zero W/b padding + ReLU).
    h = jnp.dot(h.astype(w_ref.dtype), w_ref[1], preferred_element_type=jnp.float32) + b_ref[1]
    h = jnp.maximum(h, 0.0)

    # action_head logits (padded columns carry the -1e30 bias).
    logits = jnp.dot(h.astype(w_ref.dtype), w_ref[2], preferred_element_type=jnp.float32) + b_ref[2]

    # Numerically stable softmax along the 128-wide lane axis.
    m = jnp.max(logits, axis=-1, keepdims=True)
    e = jnp.exp(logits - m)                 # padded cols -> exp(-1e30 - m) == 0
    s = jnp.sum(e, axis=-1, keepdims=True)
    r = pl.reciprocal(s, approx=True)       # EUP; essentially free next to exp
    r = r * (2.0 - s * r)                   # one Newton step -> ~f32-exact 1/s

    # Store only the real output columns (o_ref spans the full out_dim).
    o_ref[...] = (e[:, 0:out_dim] * r).astype(o_ref.dtype)


def pack_params(params, input_dim, hidden_dim, output_dim, *, compute_dtype=jnp.bfloat16):
    """Consolidate (w1,b1,w2,b2,w3,b3) into one weight stack + one bias stack.

    Weights are stored as [in, out], zero-padded to a common lane-aligned
    square [S, S]; biases are padded to [1, S] with 0 (b1, b2) or -1e30 (b3,
    so padded softmax columns contribute nothing).  S stays at 128 on purpose:
    the kernel is bandwidth/overhead bound, so filling the 256-wide MXU dims
    on v6e/v7x would only add zero-compute and padding bytes.
    """
    S = _round_up(max(input_dim, hidden_dim, output_dim), _LANE)

    def pad_w(w):
        return jnp.pad(w, ((0, S - w.shape[0]), (0, S - w.shape[1])))

    def pad_b(b, fill):
        b = b.reshape(1, -1)
        return jnp.pad(b, ((0, 0), (0, S - b.shape[1])), constant_values=fill)

    w_packed = jnp.stack(
        [pad_w(params["w1"]), pad_w(params["w2"]), pad_w(params["w3"])]
    ).astype(compute_dtype)
    b_packed = jnp.stack(
        [pad_b(params["b1"], 0.0), pad_b(params["b2"], 0.0), pad_b(params["b3"], _NEG)]
    ).astype(jnp.float32)

    return {
        "w": w_packed,
        "b": b_packed,
        "padded_dim": S,
        "in_dim": input_dim,
        "out_dim": output_dim,
    }


def policy_network_forward(x, packed, *, tile_b=2048):
    """x: [batch, input_dim] float32; packed: output of pack_params()."""
    w, b = packed["w"], packed["b"]
    S, in_dim, out_dim = packed["padded_dim"], packed["in_dim"], packed["out_dim"]
    batch, x_in_dim = x.shape
    assert x_in_dim == in_dim, "input feature dim mismatch"

    # Batch tile: multiple of 8 sublanes, capped so there are >= 2 grid steps
    # whenever batch allows it (lets ("parallel",) shard across both v7x TCs).
    tb = min(tile_b, _round_up(pl.cdiv(batch, 2), 8))
    grid = pl.cdiv(batch, tb)  # ragged last block: OOB rows are independent
                               # garbage on read and skipped on write.

    kernel = functools.partial(_policy_kernel, in_dim=in_dim, out_dim=out_dim)

    return pl.pallas_call(
        kernel,
        out_shape=jax.ShapeDtypeStruct((batch, out_dim), jnp.float32),
        grid=(grid,),
        in_specs=[
            pl.BlockSpec((tb, in_dim), lambda i: (i, 0)),   # x (streamed, unpadded f32)
            pl.BlockSpec((3, S, S), lambda i: (0, 0, 0)),   # weights (resident)
            pl.BlockSpec((3, 1, S), lambda i: (0, 0, 0)),   # biases  (resident)
        ],
        out_specs=pl.BlockSpec((tb, out_dim), lambda i: (i, 0)),  # slim output stream
        compiler_params=pltpu.CompilerParams(
            dimension_semantics=("parallel",),              # shard batch across TCs (v7x)
        ),
    )(x, w, b)


def init_params(key, input_dim, hidden_dim, output_dim):
    """Deterministic synthetic init (PyTorch-like uniform fan-in scaling)."""
    ks = jax.random.split(key, 6)

    def lin(kw, kb, fan_in, fan_out):
        bound = 1.0 / jnp.sqrt(fan_in)
        # stored as [in, out] (transpose of torch's [out, in])
        w = jax.random.uniform(kw, (fan_in, fan_out), jnp.float32, -bound, bound)
        b = jax.random.uniform(kb, (1, fan_out), jnp.float32, -bound, bound)
        return w, b

    w1, b1 = lin(ks[0], ks[1], input_dim, hidden_dim)
    w2, b2 = lin(ks[2], ks[3], hidden_dim, hidden_dim)
    w3, b3 = lin(ks[4], ks[5], hidden_dim, output_dim)
    return {"w1": w1, "b1": b1, "w2": w2, "b2": b2, "w3": w3, "b3": b3}


def _reference_f32(x, p):
    """Original full-f32 forward (the PyTorch semantics)."""
    h1 = jax.nn.relu(x @ p["w1"] + p["b1"])
    h2 = jax.nn.relu(h1 @ p["w2"] + p["b2"])
    return jax.nn.softmax(h2 @ p["w3"] + p["b3"], axis=-1)


def _reference_packed(x, packed):
    """Reference with the same bf16 operands / f32 accumulation as the kernel."""
    w, b, S = packed["w"], packed["b"], packed["padded_dim"]
    xp = jnp.pad(x, ((0, 0), (0, S - x.shape[1]))).astype(w.dtype)
    h = jnp.maximum(jnp.dot(xp, w[0], preferred_element_type=jnp.float32) + b[0], 0.0)
    h = jnp.maximum(jnp.dot(h.astype(w.dtype), w[1], preferred_element_type=jnp.float32) + b[1], 0.0)
    logits = jnp.dot(h.astype(w.dtype), w[2], preferred_element_type=jnp.float32) + b[2]
    return jax.nn.softmax(logits, axis=-1)[:, : packed["out_dim"]]


if __name__ == "__main__":
    input_dim, hidden_dim, output_dim = 16, 32, 8
    batch = 10  # not a multiple of 8 -> exercises the ragged last block path

    key = jax.random.PRNGKey(0)
    k_x, k_p = jax.random.split(key)
    x = jax.random.normal(k_x, (batch, input_dim), jnp.float32)
    params = init_params(k_p, input_dim, hidden_dim, output_dim)
    packed = pack_params(params, input_dim, hidden_dim, output_dim)

    fwd = jax.jit(lambda xx: policy_network_forward(xx, packed))
    out = jax.block_until_ready(fwd(x))

    assert out.shape == (batch, output_dim)

    ref_bits = _reference_packed(x, packed)   # matched-precision reference
    ref_f32 = _reference_f32(x, params)       # original f32 semantics

    assert jnp.allclose(out, ref_bits, atol=1e-5, rtol=1e-4), "mismatch vs matched-precision reference"
    assert jnp.allclose(out, ref_f32, atol=5e-2), "mismatch vs f32 reference (bf16 quantization sanity)"
    assert jnp.allclose(jnp.sum(out, axis=-1), 1.0, atol=1e-5), "softmax rows must sum to 1"

    print("KERNEL_OK")
</pallas_src>

<mosaic_0001>
module attributes {stable_mosaic.version = 11 : i64} {
  func.func @_policy_kernel(%arg0: i32, %arg1: memref<8x16xf32, #tpu.memory_space<vmem>>, %arg2: memref<3x128x128xbf16, #tpu.memory_space<vmem>>, %arg3: memref<3x1x128xf32, #tpu.memory_space<vmem>>, %arg4: memref<8x8xf32, #tpu.memory_space<vmem>>) attributes {dimension_semantics = [#tpu.dimension_semantics<parallel>], iteration_bounds = array<i64: 2>, scalar_prefetch = 0 : i64, scratch_operands = 0 : i64, tpu.core_type = #tpu.core_type<tc>, window_params = [{transform_indices = @transform_0, window_bounds = array<i64: 8, 16>}, {pipeline_mode = #tpu.pipeline_mode<synchronous>, transform_indices = @transform_1, window_bounds = array<i64: 3, 128, 128>}, {pipeline_mode = #tpu.pipeline_mode<synchronous>, transform_indices = @transform_2, window_bounds = array<i64: 3, 1, 128>}, {transform_indices = @transform_3, window_bounds = array<i64: 8, 8>}]} {
    %c0 = arith.constant 0 : index
    %c0_0 = arith.constant 0 : index
    %0 = vector.load %arg1[%c0, %c0_0] : memref<8x16xf32, #tpu.memory_space<vmem>>, vector<8x16xf32>
    %1 = arith.truncf %0 : vector<8x16xf32> to vector<8x16xbf16>
    %c0_1 = arith.constant 0 : index
    %c0_2 = arith.constant 0 : index
    %c0_3 = arith.constant 0 : index
    %2 = vector.load %arg2[%c0_1, %c0_2, %c0_3] : memref<3x128x128xbf16, #tpu.memory_space<vmem>>, vector<1x16x128xbf16>
    %3 = vector.shape_cast %2 : vector<1x16x128xbf16> to vector<16x128xbf16>
    %cst = arith.constant dense<0.000000e+00> : vector<8x128xf32>
    %4 = tpu.matmul %1, %3, %cst {dimension_numbers = #tpu.dot_dimension_numbers<[1], [0], [0], [1], [0, 0, 1, 1], [], []>} : vector<8x16xbf16>, vector<16x128xbf16>, vector<8x128xf32> -> vector<8x128xf32>
    %c0_4 = arith.constant 0 : index
    %c0_5 = arith.constant 0 : index
    %c0_6 = arith.constant 0 : index
    %5 = vector.load %arg3[%c0_4, %c0_5, %c0_6] : memref<3x1x128xf32, #tpu.memory_space<vmem>>, vector<1x1x128xf32>
    %6 = vector.shape_cast %5 : vector<1x1x128xf32> to vector<1x128xf32>
    %7 = vector.broadcast %6 : vector<1x128xf32> to vector<8x128xf32>
    %8 = arith.addf %4, %7 : vector<8x128xf32>
    %cst_7 = arith.constant 0.000000e+00 : f32
    %9 = vector.broadcast %cst_7 : f32 to vector<8x128xf32>
    %10 = arith.maximumf %8, %9 : vector<8x128xf32>
    %11 = arith.truncf %10 : vector<8x128xf32> to vector<8x128xbf16>
    %c1 = arith.constant 1 : index
    %c0_8 = arith.constant 0 : index
    %c0_9 = arith.constant 0 : index
    %12 = vector.load %arg2[%c1, %c0_8, %c0_9] : memref<3x128x128xbf16, #tpu.memory_space<vmem>>, vector<1x128x128xbf16>
    %13 = vector.shape_cast %12 : vector<1x128x128xbf16> to vector<128x128xbf16>
    %cst_10 = arith.constant dense<0.000000e+00> : vector<8x128xf32>
    %14 = tpu.matmul %11, %13, %cst_10 {dimension_numbers = #tpu.dot_dimension_numbers<[1], [0], [0], [1], [0, 0, 1, 1], [], []>} : vector<8x128xbf16>, vector<128x128xbf16>, vector<8x128xf32> -> vector<8x128xf32>
    %c1_11 = arith.constant 1 : index
    %c0_12 = arith.constant 0 : index
    %c0_13 = arith.constant 0 : index
    %15 = vector.load %arg3[%c1_11, %c0_12, %c0_13] : memref<3x1x128xf32, #tpu.memory_space<vmem>>, vector<1x1x128xf32>
    %16 = vector.shape_cast %15 : vector<1x1x128xf32> to vector<1x128xf32>
    %17 = vector.broadcast %16 : vector<1x128xf32> to vector<8x128xf32>
    %18 = arith.addf %14, %17 : vector<8x128xf32>
    %cst_14 = arith.constant 0.000000e+00 : f32
    %19 = vector.broadcast %cst_14 : f32 to vector<8x128xf32>
    %20 = arith.maximumf %18, %19 : vector<8x128xf32>
    %21 = arith.truncf %20 : vector<8x128xf32> to vector<8x128xbf16>
    %c2 = arith.constant 2 : index
    %c0_15 = arith.constant 0 : index
    %c0_16 = arith.constant 0 : index
    %22 = vector.load %arg2[%c2, %c0_15, %c0_16] : memref<3x128x128xbf16, #tpu.memory_space<vmem>>, vector<1x128x128xbf16>
    %23 = vector.shape_cast %22 : vector<1x128x128xbf16> to vector<128x128xbf16>
    %cst_17 = arith.constant dense<0.000000e+00> : vector<8x128xf32>
    %24 = tpu.matmul %21, %23, %cst_17 {dimension_numbers = #tpu.dot_dimension_numbers<[1], [0], [0], [1], [0, 0, 1, 1], [], []>} : vector<8x128xbf16>, vector<128x128xbf16>, vector<8x128xf32> -> vector<8x128xf32>
    %c2_18 = arith.constant 2 : index
    %c0_19 = arith.constant 0 : index
    %c0_20 = arith.constant 0 : index
    %25 = vector.load %arg3[%c2_18, %c0_19, %c0_20] : memref<3x1x128xf32, #tpu.memory_space<vmem>>, vector<1x1x128xf32>
    %26 = vector.shape_cast %25 : vector<1x1x128xf32> to vector<1x128xf32>
    %27 = vector.broadcast %26 : vector<1x128xf32> to vector<8x128xf32>
    %28 = arith.addf %24, %27 : vector<8x128xf32>
    %cst_21 = arith.constant dense<0xFF800000> : vector<8xf32>
    %29 = vector.multi_reduction <maximumf>, %28, %cst_21 [1] : vector<8x128xf32> to vector<8xf32>
    %30 = vector.shape_cast %29 : vector<8xf32> to vector<8x1xf32>
    %31 = vector.broadcast %30 : vector<8x1xf32> to vector<8x128xf32>
    %32 = arith.subf %28, %31 : vector<8x128xf32>
    %33 = math.exp %32 : vector<8x128xf32>
    %cst_22 = arith.constant dense<0.000000e+00> : vector<8xf32>
    %34 = vector.multi_reduction <add>, %33, %cst_22 [1] : vector<8x128xf32> to vector<8xf32>
    %35 = vector.shape_cast %34 : vector<8xf32> to vector<8x1xf32>
    %36 = tpu.reciprocal %35 {approx = true} : vector<8x1xf32> -> vector<8x1xf32>
    %37 = arith.mulf %35, %36 : vector<8x1xf32>
    %cst_23 = arith.constant 2.000000e+00 : f32
    %38 = vector.broadcast %cst_23 : f32 to vector<8x1xf32>
    %39 = arith.subf %38, %37 : vector<8x1xf32>
    %40 = arith.mulf %36, %39 : vector<8x1xf32>
    %41 = vector.extract_strided_slice %33 {offsets = [0, 0], sizes = [8, 8], strides = [1, 1]} : vector<8x128xf32> to vector<8x8xf32>
    %42 = vector.broadcast %40 : vector<8x1xf32> to vector<8x8xf32>
    %43 = arith.mulf %41, %42 : vector<8x8xf32>
    %c0_24 = arith.constant 0 : index
    %c0_25 = arith.constant 0 : index
    %44 = vector.load %arg4[%c0_24, %c0_25] : memref<8x8xf32, #tpu.memory_space<vmem>>, vector<8x8xf32>
    tpu.vector_store %arg4[%c0_24, %c0_25], %43 {strides = array<i32>} : memref<8x8xf32, #tpu.memory_space<vmem>>, vector<8x8xf32>,
    return
  }
  func.func @transform_0(%arg0: i32) -> (i32, i32) {
    %c0_i32 = arith.constant 0 : i32
    %c0_i32_0 = arith.constant 0 : i32
    return %arg0, %c0_i32 : i32, i32
  }
  func.func @transform_1(%arg0: i32) -> (i32, i32, i32) {
    %c0_i32 = arith.constant 0 : i32
    %c0_i32_0 = arith.constant 0 : i32
    %c0_i32_1 = arith.constant 0 : i32
    %c0_i32_2 = arith.constant 0 : i32
    return %c0_i32, %c0_i32_0, %c0_i32_1 : i32, i32, i32
  }
  func.func @transform_2(%arg0: i32) -> (i32, i32, i32) {
    %c0_i32 = arith.constant 0 : i32
    %c0_i32_0 = arith.constant 0 : i32
    %c0_i32_1 = arith.constant 0 : i32
    %c0_i32_2 = arith.constant 0 : i32
    return %c0_i32, %c0_i32_0, %c0_i32_1 : i32, i32, i32
  }
  func.func @transform_3(%arg0: i32) -> (i32, i32) {
    %c0_i32 = arith.constant 0 : i32
    %c0_i32_0 = arith.constant 0 : i32
    return %arg0, %c0_i32 : i32, i32
  }
}

</mosaic_0001>

<bundles_post_ra>
// kernel: _lambda_.1
= control target key start
LH: loop header
LB: loop body
LE: loop exit
PB: predicated region body
PF: predicated region fallthrough
CT: control target
= control target key end

     0   :  { %8 = vsyncpa [#allocation3], 0  ;;  %s957_s0 = inlined_call_operand.hbm [shape: f32[10,16], index: 0, kind: input, shape index: {}]   ;;  %s958_s1 = inlined_call_operand.hbm [shape: bf16[3,128,128], index: 1, kind: input, shape index: {}]   ;;  %s959_s2 = inlined_call_operand.hbm [shape: f32[3,1,128], index: 2, kind: input, shape index: {}]   ;;  %s960_s3 = inlined_call_operand.vmem [shape: f32[10,8], index: 3, kind: output, shape index: {}]  }
   0x1   :  { %10 = vsyncpa [#allocation3 + $0x1], 0 }
   0x2   :  { %11 = vsyncpa [#allocation5], 0  ;;  %s848_s12 = smov 0   ;;  %s850_s13 = smov 0  }
   0x3   :  { %s852_s14 = smov 0   ;;  %s854_s15 = smov 0  }
   0x4 LB: > { %s127_s18 = sshll.u32 %s958_s1, 4  ;;  %s872_s19 = sadd.s32 4294967295, %s820_s15   ;;  %s820_s15 = sphi %s854_s15, %s967_s15   ;;  %s816_s14 = sphi %s852_s14, %s966_s14   ;;  %s812_s13 = sphi %s850_s13, %s965_s13   ;;  %s808_s12 = sphi %s848_s12, %s964_s12   ;;  %s128_s18 = int_to_ptr.hbm [resolvable:$true] %s127_s18 }
   0x5   : > { %p522_p0 = scmp.ge.s32.totalorder %s820_s15, 1  ;;  %p38_p1 = scmp.eq.s32.totalorder %s872_s19, 0 }
   0x6   : > { %p116_p2 = scmp.lt.s32.totalorder %s820_s15, 3  ;;  %s822_s21 = smov [#allocation4]  }
   0x7   : > { %s129_s22 = sshll.u32 %s822_s21, 4  ;;  %s141_s25 = sshll.u32 %s959_s2, 4  ;;  %s130_s22 = int_to_ptr.vmem [resolvable:$true] %s129_s22  ;;  %s142_s25 = int_to_ptr.hbm [resolvable:$true] %s141_s25 }
   0x8   : > { %p877_p3 = pnand %p522_p0, %p116_p2  ;;  %s823_s26 = smov [#allocation6]  }
   0x9   : > { %s143_s27 = sshll.u32 %s823_s26, 4  ;;  %s824_s28 = smov 64   ;;  %s144_s27 = int_to_ptr.vmem [resolvable:$true] %s143_s27 }
   0xa   : > { %p631_p4 = pneg %p877_p3  ;;  %s825_s29 = smov 4  }
   0xb   : > { %s826_s30 = smov 16   ;;  %s827_s4 = smov 1  }
   0xc   : > { %p632_p5 = pnand %p631_p4, %p38_p1  ;;  %s889_s5 = sadd.s32 1, %s820_s15  }
   0xd   : > { %s21_s6 = ssub.s32 %s820_s15, %s889_s5  ;;  %s24_s7 = sadd.s32 1, %s816_s14 }
   0xe   : > { %634 = dma.hbm_to_vmem [thread:$0]  (!%p632_p5), %s128_s18, 3072, %s130_s22, [#allocation5], %s824_s28, %s824_s28, %s825_s29  }
   0xf   : > { %637 = dma.hbm_to_vmem [thread:$0]  (!%p632_p5), %s142_s25, 48, %s144_s27, [#allocation5], %s826_s30, %s826_s30, %s827_s4  }
  0x10   : > { %p22_p6 = scmp.eq.s32.totalorder %s21_s6, 0  ;;  %p31_p7 = scmp.ne.s32.totalorder %s816_s14, %s812_s13 }
  0x11   : > { %p32_p8 = scmp.eq.s32.totalorder %s820_s15, 0  ;;  %p37_p9 = scmp.ne.s32.totalorder %s812_s13, %s808_s12 }
  0x12   : > { %s900_s8 = scalar_select %p22_p6, %s816_s14, %s24_s7  }
  0x13   : > { %p904_p10 = por %p38_p1, %p37_p9  ;;  %p644_p11 = scmp.lt.s32.totalorder %s820_s15, 2 }
  0x14   : > { %s157_s10 = sand.u32 1, %s816_s14   ;;  %s527_s11 = sshll.u32 %s820_s15, 3 }
  0x15   : > { %p33_p12 = por %p32_p8, %p31_p7  ;;  %s526_s16 = sshll.u32 %s157_s10, 3 }
  0x16   : > { %s165_s21 = scalar_lea.hbm %s957_s0, %s527_s11  ;;  %s161_s23 = scalar_lea.vmem [#allocation2], %s526_s16 }
  0x17   : > { %s167_s22 = sshll.u32 %s165_s21, 4  ;;  %s169_s24 = sshll.u32 %s161_s23, 4  ;;  %s168_s22 = int_to_ptr.hbm [resolvable:$true] %s167_s22  ;;  %s170_s24 = int_to_ptr.vmem [resolvable:$true] %s169_s24 }
  0x18   : > { %p914_p13 = pnand %p644_p11, %p33_p12  ;;  %s158_s25 = scalar_lea.sflag [#allocation3], %s157_s10 }
  0x19   : > { %s752_s26 = sshra.s32 %s168_s22, 4  ;;  %s759_s29 = scalar_lea.hbm %s957_s0, 16  ;;  %s753_s26 = int_to_ptr.hbm [resolvable:$true] %s752_s26 }
  0x1a   : > { %s754_s15 = scalar_lea.hbm %s753_s26, 8  ;;  %p756_p2 = pneg %p914_p13 }
  0x1b   : > { %p755_p0 = scmp.ne.s32.totalorder %s753_s26, %s754_s15  ;;  %p760_p6 = scmp.lt.s32.totalorder %s753_s26, %s957_s0 }
  0x1c   : > { %p761_p7 = scmp.lt.s32.totalorder %s759_s29, %s754_s15 }
  0x1d   : > { %p757_p4 = pnand %p756_p2, %p755_p0 }
  0x1e   : > { %p762_p8 = por %p761_p7, %p760_p6 }
  0x1f   : > { %p758_p5 = pneg %p757_p4 }
  0x21   : > { %p763_p9 = pnand %p762_p8, %p758_p5 }
  0x23   : > { %766 = shalt.err (!%p763_p9)
}
  0x24   : > { %641 = dma.hbm_to_vmem [thread:$0]  (!%p914_p13), %s168_s22, 128, %s170_s24, %s158_s25  }
  0x25   : > { %178 = sbr.rel (%p877_p3) target bundleno = 706 (0x2c2), region = 32  ;;  %s180_s6 = sand.u32 (!%p877_p3), 1, %s812_s13  }
  0x26   : > { %s529_s7 = sshll.u32 (!%p877_p3), %s180_s6, 3  ;;  %s181_s10 = scalar_lea.sflag (!%p877_p3), [#allocation3], %s180_s6 }
  0x27   : > { %s184_s11 = scalar_lea.vmem (!%p877_p3), [#allocation2], %s529_s7 }
  0x2a   : > { %799 = dma.done.wait (%p904_p10), %s181_s10, 128  }
  0x2b   : > { %801 = vsyncadd (%p904_p10), %s181_s10, 4294967168 }
  0x2c   : > { %803 = dma.done.wait (%p38_p1), [#allocation5], 3120  }
  0x2d   : > { %805 = vsyncadd (%p38_p1), [#allocation5], 4294964176  ;;  %v604_v0 = vld [vmem:[#allocation4] sm:$0xff]  ;;  %v222_v1 = vld [vmem:[%s184_s11] sm:$0xff]  ;;  %vm236_vm0 = vcmask 130048   ;;  %p217_p1 = scmp.lt.s32.totalorder %s872_s19, 1 }
  0x2e   : > { %v612_v2 = vld [vmem:[#allocation4 + $0x78] sm:$0xff]  ;;  %v223_v3 = vpack.c.bf16 %v222_v1, %v222_v1  ;;  %247 = vmatpush.bf16.msra.mxu0 %v604_v0  ;;  %v611_v4 = vld [vmem:[#allocation4 + $0x70] sm:$0xff]  ;;  %v610_v5 = vld [vmem:[#allocation4 + $0x68] sm:$0xff]  ;;  %vm435_vm1 = vcmask 64512  }
  0x2f   : > { %325 = vmatpush.bf16.msra.mxu1 %v612_v2  ;;  %v609_v6 = vld [vmem:[#allocation4 + $0x60] sm:$0xff]  ;;  %v608_v7 = vld [vmem:[#allocation4 + $0x58] sm:$0xff]  ;;  %v607_v8 = vld [vmem:[#allocation4 + $0x50] sm:$0xff]  ;;  %s969_s19 = smov (!%p217_p1, %s872_s19), 1 }
  0x30   : > { %v606_v9 = vld [vmem:[#allocation4 + $0x48] sm:$0xff]  ;;  %v605_v10 = vld [vmem:[#allocation4 + $0x40] sm:$0xff]  ;;  %v620_v11 = vld [vmem:[#allocation4 + $0xb8] sm:$0xff]  ;;  %s532_s20 = sshll.u32 %s969_s19, 3 }
  0x31   : > { %537 = vmatmul.msk.bf16.vlgmr.msra.gmra.mxu0 %vm236_vm0, %v223_v3  ;;  %410 = vmatpush.bf16.msra.mxu2 %v620_v11  ;;  %v619_v12 = vld [vmem:[#allocation4 + $0xb0] sm:$0xff]  ;;  %v618_v13 = vld [vmem:[#allocation4 + $0xa8] sm:$0xff]  ;;  %v617_v14 = vld [vmem:[#allocation4 + $0xa0] sm:$0xff]  ;;  %s220_s17 = scalar_lea.vmem %s960_s3, %s532_s20 }
  0x32   : > { %v616_v15 = vld [vmem:[#allocation4 + $0x98] sm:$0xff]  ;;  %v615_v16 = vld [vmem:[#allocation4 + $0x90] sm:$0xff]  ;;  %v685_v17 = vld [vmem:[#allocation6] ss:$0 sm:$0xff] }
  0x33   : > { %326 = vmatpush.bf16.msra.mxu1 %v611_v4  ;;  %v614_v23 = vld [vmem:[#allocation4 + $0x88] sm:$0xff]  ;;  %v613_v24 = vld [vmem:[#allocation4 + $0x80] sm:$0xff] }
  0x34   : > { %v686_v25 = vld [vmem:[#allocation6 + $0x1] ss:$0 sm:$0xff]  ;;  %v687_v31 = vld [vmem:[#allocation6 + $0x2] ss:$0 sm:$0xff] }
  0x35   : > { %411 = vmatpush.bf16.msra.mxu2 %v619_v12 }
  0x37   : > { %327 = vmatpush.bf16.msra.mxu1 %v610_v5 }
  0x39   : > { %412 = vmatpush.bf16.msra.mxu2 %v618_v13 }
  0x3b   : > { %328 = vmatpush.bf16.msra.mxu1 %v609_v6 }
  0x3d   : > { %413 = vmatpush.bf16.msra.mxu2 %v617_v14 }
  0x3f   : > { %329 = vmatpush.bf16.msra.mxu1 %v608_v7 }
  0x41   : > { %414 = vmatpush.bf16.msra.mxu2 %v616_v15 }
  0x43   : > { %330 = vmatpush.bf16.msra.mxu1 %v607_v8 }
  0x45   : > { %415 = vmatpush.bf16.msra.mxu2 %v615_v16 }
  0x47   : > { %331 = vmatpush.bf16.msra.mxu1 %v606_v9 }
  0x49   : > { %416 = vmatpush.bf16.msra.mxu2 %v614_v23 }
  0x4b   : > { %332 = vmatpush.bf16.msra.mxu1 %v605_v10 }
  0x4d   : > { %417 = vmatpush.bf16.msra.mxu2 %v613_v24 }
  0xae   : > { %v249_v18 = vpop.f32.mrf.mxu0 }
  0xaf   : > { %v250_v19 = vadd.f32 %v685_v17, %v249_v18 }
  0xb1   : > { %v253_v20 = vmax.f32 %v250_v19, 0.0 }
  0xb3   : > { %v254_v21 = vpack.c.bf16 %v253_v20, %v253_v20 }
  0xb5   : > { %333 = vmatmul.bf16.vlgmr.msra.gmra.mxu1 %v254_v21 }
  0xb6   : > { %v251_v22 = vpop.f32.mrf.mxu0 }
 0x132   : > { %v334_v26 = vpop.f32.mrf.mxu1 }
 0x133   : > { %v335_v27 = vadd.f32 %v686_v25, %v334_v26 }
 0x135   : > { %v338_v28 = vmax.f32 %v335_v27, 0.0 }
 0x137   : > { %v339_v29 = vpack.c.bf16 %v338_v28, %v338_v28 }
 0x139   : > { %418 = vmatmul.bf16.vlgmr.msra.gmra.mxu2 %v339_v29 }
 0x13a   : > { %v336_v30 = vpop.f32.mrf.mxu1 }
 0x1bc   : > { %v419_v32 = vpop.f32.mrf.mxu2 }
 0x1bd   : > { %v420_v33 = vadd.f32 %v687_v31, %v419_v32 }
 0x1bf   : > { %423 = vmax.xlane.f32.xlu0 %v420_v33 }
 0x1c4   : > { %v421_v34 = vpop.f32.mrf.mxu2 }
 0x232   : > { %v424_v35 = vpop.xlane.xlu0 %423 }
 0x233   : > { %v425_v36 = vsub.f32 %v420_v33, %v424_v35 }
 0x235   : > { %v426_v37 = vmul.f32 1.442695, %v425_v36 }
 0x237   : > { %688 = vpow2.f32 %v426_v37 }
 0x23d   : > { %v689_v38 = vpop.eup %688 }
 0x23e   : > { %428 = vadd.xlane.f32.xlu0 %v689_v38 }
 0x2b1   : > { %v429_v39 = vpop.xlane.xlu0 %428 }
 0x2b2   : > { %690 = vrcp.f32 %v429_v39 }
 0x2b8   : > { %v691_v40 = vpop.eup %690 }
 0x2b9   : > { %v431_v41 = vmul.f32 %v691_v40, %v429_v39 }
 0x2bb   : > { %v432_v42 = vsub.f32 2.0, %v431_v41 }
 0x2bd   : > { %v433_v43 = vmul.f32 %v691_v40, %v432_v42 }
 0x2bf   : > { %v434_v44 = vmul.f32 %v689_v38, %v433_v43 }
 0x2c1   : > { %436 = vst.msk [vmem:[%s220_s17] sm:$0xff] %vm435_vm1, %v434_v44 }
 0x2c2 PF: > { %p14_p3 = scmp.ge.s32.totalorder %s889_s5, 4   ;;  %s964_s12 = smov %s812_s13 }
 0x2c3   : > { %s965_s13 = smov %s816_s14  ;;  %s966_s14 = smov %s900_s8 }
 0x2c4   : > { %s967_s15 = smov %s889_s5  ;;  %16 = sbr.rel (!%p14_p3) target bundleno = 4 (0x4), region = 84 }
 0x2c9   :  { %456 = vsyncpa [#allocation3], 1 }
 0x2ca   :  { %458 = vsyncpa [#allocation3 + $0x1], 1 }
 0x2cb   :  { %459 = vsyncpa [#allocation5], 1 }

</bundles_post_ra>
